<compile_context>
chip_gen: v5e
topology: v5e:2x2
jax: 0.10.0
libtpu: 0.0.40
codegen_flags: <defaults>
</compile_context>

<pallas_src>
import functools
import math

import jax
import jax.numpy as jnp
from jax.experimental import pallas as pl
from jax.experimental.pallas import tpu as pltpu


# ----------------------------- irreps config ------------------------------
# irreps_in  = "16x0e + 8x1o"   -> dim_in  = 16*1 + 8*3  = 40
# irreps_out = "8x0e  + 4x1o"   -> dim_out = 8*1  + 4*3  = 20
IRREPS_IN = [(16, 0), (8, 1)]   # (multiplicity, l)
IRREPS_OUT = [(8, 0), (4, 1)]

SUBLANE = 8     # sublane width (second-to-last dim granularity)


def irreps_dim(irreps):
    return sum(mul * (2 * l + 1) for mul, l in irreps)


def _round_up(x, m):
    return (x + m - 1) // m * m


def _choose_tile(n, requested):
    """Row-tile size: multiple of 8, <= padded N, and small enough that the
    grid has >= 2 steps when there is enough work (v7x dual-TC sharding)."""
    tile = max(SUBLANE, _round_up(min(requested, _round_up(n, SUBLANE)), SUBLANE))
    if n >= 2 * SUBLANE:
        half = _round_up(-(-n // 2), SUBLANE)   # ceil(n/2) rounded to 8
        tile = min(tile, half)
    return tile


# ------------------------------ Pallas kernel ------------------------------
def linear_kernel(x_ref, w_ref, o_ref):
    # One MXU matmul per node tile; f32 accumulation; unpadded (masked) store.
    o_ref[...] = jnp.dot(
        x_ref[...], w_ref[...], preferred_element_type=jnp.float32
    ).astype(o_ref.dtype)


@functools.partial(jax.jit, static_argnames=("tile_n",))
def vanilla_readout(x, w_full, *, tile_n=2048):
    """x: [N, dim_in] f32, w_full: [dim_in, dim_out] f32 dense block-diagonal
    weight with 1/sqrt(fan_in) folded in. Returns [N, dim_out] f32."""
    n, dim_in = x.shape
    dim_out = w_full.shape[1]

    tile = _choose_tile(n, tile_n)
    n_pad = _round_up(n, tile)

    # Row-only padding, and only when N is not a tile multiple (no-op on the
    # common path). Columns are never padded: last block dims equal the full
    # array extents, which is legal regardless of the (8, 128) rule.
    x_in = x
    if n_pad != n:
        x_in = jnp.zeros((n_pad, dim_in), x.dtype).at[:n].set(x)

    out = pl.pallas_call(
        linear_kernel,
        out_shape=jax.ShapeDtypeStruct((n_pad, dim_out), jnp.float32),
        grid=(n_pad // tile,),
        in_specs=[
            pl.BlockSpec((tile, dim_in), lambda i: (i, 0)),      # stream x tiles
            pl.BlockSpec((dim_in, dim_out), lambda i: (0, 0)),   # weight resident
        ],
        out_specs=pl.BlockSpec((tile, dim_out), lambda i: (i, 0)),
        compiler_params=pltpu.CompilerParams(
            dimension_semantics=("parallel",)  # shard node axis across TCs (v7x)
        ),
    )(x_in, w_full)

    return out if n_pad == n else out[:n]


# --------------------------- parameter construction ------------------------
def build_weights(key):
    """Per-irrep weights ~ N(0,1) (e3nn internal_weights init), plus the
    equivalent dense block-structured matrix with 1/sqrt(fan_in) folded in."""
    dim_in = irreps_dim(IRREPS_IN)
    dim_out = irreps_dim(IRREPS_OUT)
    per_irrep = []
    w_full = jnp.zeros((dim_in, dim_out), dtype=jnp.float32)

    in_off = 0
    in_offsets = {}
    for mul, l in IRREPS_IN:
        in_offsets[l] = (in_off, mul)
        in_off += mul * (2 * l + 1)

    out_off = 0
    keys = jax.random.split(key, len(IRREPS_OUT))
    for k, (mul_out, l) in zip(keys, IRREPS_OUT):
        d = 2 * l + 1
        i_off, mul_in = in_offsets[l]
        w = jax.random.normal(k, (mul_in, mul_out), dtype=jnp.float32)
        per_irrep.append((l, w, i_off, out_off, mul_in, mul_out))
        block = jnp.kron(w / math.sqrt(mul_in), jnp.eye(d, dtype=jnp.float32))
        w_full = w_full.at[i_off:i_off + mul_in * d,
                           out_off:out_off + mul_out * d].set(block)
        out_off += mul_out * d
    return per_irrep, w_full


def reference_forward(x, per_irrep, dim_out):
    """Pure-JAX f32 reference of o3.Linear forward (per-irrep einsum)."""
    n = x.shape[0]
    out = jnp.zeros((n, dim_out), dtype=jnp.float32)
    for l, w, i_off, o_off, mul_in, mul_out in per_irrep:
        d = 2 * l + 1
        xi = x[:, i_off:i_off + mul_in * d].reshape(n, mul_in, d)
        yi = jnp.einsum("zui,uw->zwi", xi, w) / math.sqrt(mul_in)
        out = out.at[:, o_off:o_off + mul_out * d].set(yi.reshape(n, mul_out * d))
    return out


# ----------------------------------- main -----------------------------------
if __name__ == "__main__":
    key = jax.random.PRNGKey(0)
    k_x, k_w = jax.random.split(key)

    dim_in = irreps_dim(IRREPS_IN)    # 40
    dim_out = irreps_dim(IRREPS_OUT)  # 20
    n_nodes = 512                     # small, but exercises the 2-step grid

    x = jax.random.normal(k_x, (n_nodes, dim_in), dtype=jnp.float32)
    per_irrep, w_full = build_weights(k_w)

    out = vanilla_readout(x, w_full)
    out = jax.block_until_ready(out)

    ref = reference_forward(x, per_irrep, dim_out)
    assert out.shape == (n_nodes, dim_out)
    # f32 operands + f32 accumulation; tolerance covers MXU default-precision
    # (bf16-pass) rounding over the K=40 contraction.
    assert jnp.allclose(out, ref, atol=2e-2, rtol=2e-2), "mismatch vs reference"

    print("KERNEL_OK")
</pallas_src>

<mosaic_0001>
module attributes {stable_mosaic.version = 11 : i64} {
  func.func @linear_kernel(%arg0: i32, %arg1: memref<256x40xf32, #tpu.memory_space<vmem>>, %arg2: memref<40x20xf32, #tpu.memory_space<vmem>>, %arg3: memref<256x20xf32, #tpu.memory_space<vmem>>) attributes {dimension_semantics = [#tpu.dimension_semantics<parallel>], iteration_bounds = array<i64: 2>, scalar_prefetch = 0 : i64, scratch_operands = 0 : i64, tpu.core_type = #tpu.core_type<tc>, window_params = [{transform_indices = @transform_0, window_bounds = array<i64: 256, 40>}, {pipeline_mode = #tpu.pipeline_mode<synchronous>, transform_indices = @transform_1, window_bounds = array<i64: 40, 20>}, {transform_indices = @transform_2, window_bounds = array<i64: 256, 20>}]} {
    %c0 = arith.constant 0 : index
    %c0_0 = arith.constant 0 : index
    %0 = vector.load %arg1[%c0, %c0_0] : memref<256x40xf32, #tpu.memory_space<vmem>>, vector<256x40xf32>
    %c0_1 = arith.constant 0 : index
    %c0_2 = arith.constant 0 : index
    %1 = vector.load %arg2[%c0_1, %c0_2] : memref<40x20xf32, #tpu.memory_space<vmem>>, vector<40x20xf32>
    %cst = arith.constant dense<0.000000e+00> : vector<256x20xf32>
    %2 = tpu.matmul %0, %1, %cst {dimension_numbers = #tpu.dot_dimension_numbers<[1], [0], [0], [1], [0, 0, 1, 1], [], []>} : vector<256x40xf32>, vector<40x20xf32>, vector<256x20xf32> -> vector<256x20xf32>
    %c0_3 = arith.constant 0 : index
    %c0_4 = arith.constant 0 : index
    %3 = vector.load %arg3[%c0_3, %c0_4] : memref<256x20xf32, #tpu.memory_space<vmem>>, vector<256x20xf32>
    tpu.vector_store %arg3[%c0_3, %c0_4], %2 {strides = array<i32>} : memref<256x20xf32, #tpu.memory_space<vmem>>, vector<256x20xf32>,
    return
  }
  func.func @transform_0(%arg0: i32) -> (i32, i32) {
    %c0_i32 = arith.constant 0 : i32
    %c0_i32_0 = arith.constant 0 : i32
    return %arg0, %c0_i32 : i32, i32
  }
  func.func @transform_1(%arg0: i32) -> (i32, i32) {
    %c0_i32 = arith.constant 0 : i32
    %c0_i32_0 = arith.constant 0 : i32
    %c0_i32_1 = arith.constant 0 : i32
    return %c0_i32, %c0_i32_0 : i32, i32
  }
  func.func @transform_2(%arg0: i32) -> (i32, i32) {
    %c0_i32 = arith.constant 0 : i32
    %c0_i32_0 = arith.constant 0 : i32
    return %arg0, %c0_i32 : i32, i32
  }
}

</mosaic_0001>

<bundles_post_ra>
// kernel: vanilla_readout.1
= control target key start
LH: loop header
LB: loop body
LE: loop exit
PB: predicated region body
PF: predicated region fallthrough
CT: control target
= control target key end

     0   :  { %s572_s9 = smov 0   ;;  %s743_s0 = inlined_call_operand.vmem [shape: f32[512,40], index: 0, kind: input, shape index: {}]   ;;  %s744_s1 = inlined_call_operand.vmem [shape: f32[40,20], index: 1, kind: input, shape index: {}]   ;;  %s745_s2 = inlined_call_operand.vmem [shape: f32[512,20], index: 2, kind: output, shape index: {}]  }
   0x1 LB: > { %s483_s10 = sadd.s32 4294967295, %s555_s9   ;;  %p487_p0 = scmp.ge.s32.totalorder %s555_s9, 1  ;;  %s555_s9 = sphi %s572_s9, %s12_s9  }
   0x2   : > { %p113_p1 = scmp.lt.s32.totalorder %s555_s9, 3 }
   0x4   : > { %p114_p2 = pnand %p487_p0, %p113_p1 }
   0x5   : > { %s488_s15 = sshll.u32 (!%p114_p2), %s483_s10, 5 }
   0x6   : > { %117 = sbr.rel (%p114_p2) target bundleno = 211 (0xd3), region = 28  ;;  %p136_p3 = scmp.lt.s32.totalorder (!%p114_p2), %s488_s15, 63 }
   0xb   : > { %v183_v0 = vld [vmem:[%s744_s1 + $0x20] sm:$0xff]  ;;  %v182_v1 = vld [vmem:[%s744_s1 + $0x18] sm:$0xff]  ;;  %v181_v2 = vld [vmem:[%s744_s1 + $0x10] sm:$0xff]  ;;  %s747_s15 = smov (!%p136_p3, %s488_s15), 63  ;;  %vm184_vm0 = vcmask 326656   ;;  %vm394_vm1 = vcmask 162816  }
   0xc   : > { %527 = vmatpush.msra.mxu2 %v183_v0  ;;  %528 = vmatpush.msra.mxu3 %v183_v0  ;;  %v180_v3 = vld [vmem:[%s744_s1 + $0x8] sm:$0xff]  ;;  %s489_s20 = sshll.u32 %s747_s15, 3  ;;  %v179_v4 = vld [vmem:[%s744_s1] sm:$0xff] }
   0xd   : > { %292 = vmatpush.msra.mxu0 %v183_v0  ;;  %526 = vmatpush.msra.mxu1 %v183_v0  ;;  %s603_s25 = scalar_lea.vmem %s743_s0, %s489_s20  ;;  %s674_s28 = scalar_lea.vmem %s745_s2, %s489_s20 }
   0xe   : > { %530 = vmatpush.msra.mxu2 %v182_v1  ;;  %531 = vmatpush.msra.mxu3 %v182_v1  ;;  %v163_v5 = vld [vmem:[%s603_s25 + $0x80] sm:$0xff]  ;;  %v164_v9 = vld [vmem:[%s603_s25 + $0x88] sm:$0xff]  ;;  %v165_v13 = vld [vmem:[%s603_s25 + $0x90] sm:$0xff] }
   0xf   : > { %293 = vmatpush.msra.mxu0 %v182_v1  ;;  %529 = vmatpush.msra.mxu1 %v182_v1  ;;  %v171_v6 = vld [vmem:[%s603_s25 + $0xc0] sm:$0xff]  ;;  %v172_v10 = vld [vmem:[%s603_s25 + $0xc8] sm:$0xff]  ;;  %v173_v14 = vld [vmem:[%s603_s25 + $0xd0] sm:$0xff] }
  0x10   : > { %533 = vmatpush.msra.mxu2 %v181_v2  ;;  %534 = vmatpush.msra.mxu3 %v181_v2  ;;  %v147_v7 = vld [vmem:[%s603_s25] sm:$0xff]  ;;  %v148_v11 = vld [vmem:[%s603_s25 + $0x8] sm:$0xff]  ;;  %v149_v15 = vld [vmem:[%s603_s25 + $0x10] sm:$0xff] }
  0x11   : > { %294 = vmatpush.msra.mxu0 %v181_v2  ;;  %532 = vmatpush.msra.mxu1 %v181_v2  ;;  %v155_v8 = vld [vmem:[%s603_s25 + $0x40] sm:$0xff]  ;;  %v156_v12 = vld [vmem:[%s603_s25 + $0x48] sm:$0xff]  ;;  %v157_v16 = vld [vmem:[%s603_s25 + $0x50] sm:$0xff] }
  0x12   : > { %536 = vmatpush.msra.mxu2 %v180_v3  ;;  %537 = vmatpush.msra.mxu3 %v180_v3  ;;  %v166_v17 = vld [vmem:[%s603_s25 + $0x98] sm:$0xff]  ;;  %v167_v21 = vld [vmem:[%s603_s25 + $0xa0] sm:$0xff]  ;;  %v168_v25 = vld [vmem:[%s603_s25 + $0xa8] sm:$0xff] }
  0x13   : > { %295 = vmatpush.msra.mxu0 %v180_v3  ;;  %535 = vmatpush.msra.mxu1 %v180_v3  ;;  %v174_v18 = vld [vmem:[%s603_s25 + $0xd8] sm:$0xff]  ;;  %v175_v22 = vld [vmem:[%s603_s25 + $0xe0] sm:$0xff]  ;;  %v176_v26 = vld [vmem:[%s603_s25 + $0xe8] sm:$0xff] }
  0x14   : > { %539 = vmatpush.msra.mxu2 %v179_v4  ;;  %540 = vmatpush.msra.mxu3 %v179_v4  ;;  %v150_v19 = vld [vmem:[%s603_s25 + $0x18] sm:$0xff]  ;;  %v151_v23 = vld [vmem:[%s603_s25 + $0x20] sm:$0xff]  ;;  %v152_v27 = vld [vmem:[%s603_s25 + $0x28] sm:$0xff] }
  0x15   : > { %508 = vmatmul.msk.f32.vlgmr.msra.gmra.mxu2 %vm184_vm0, %v163_v5  ;;  %516 = vmatmul.msk.f32.vlgmr.msra.gmra.mxu3 %vm184_vm0, %v171_v6  ;;  %v158_v20 = vld [vmem:[%s603_s25 + $0x58] sm:$0xff]  ;;  %v159_v24 = vld [vmem:[%s603_s25 + $0x60] sm:$0xff]  ;;  %v160_v28 = vld [vmem:[%s603_s25 + $0x68] sm:$0xff] }
  0x16   : > { %296 = vmatpush.msra.mxu0 %v179_v4  ;;  %538 = vmatpush.msra.mxu1 %v179_v4  ;;  %v169_v29 = vld [vmem:[%s603_s25 + $0xb0] sm:$0xff]  ;;  %v170_v33 = vld [vmem:[%s603_s25 + $0xb8] sm:$0xff] }
  0x17   : > { %492 = vmatmul.msk.f32.vlgmr.msra.gmra.mxu0 %vm184_vm0, %v147_v7  ;;  %500 = vmatmul.msk.f32.vlgmr.msra.gmra.mxu1 %vm184_vm0, %v155_v8  ;;  %v177_v30 = vld [vmem:[%s603_s25 + $0xf0] sm:$0xff]  ;;  %v178_v34 = vld [vmem:[%s603_s25 + $0xf8] sm:$0xff] }
  0x18   : > { %v153_v31 = vld [vmem:[%s603_s25 + $0x30] sm:$0xff]  ;;  %v154_v35 = vld [vmem:[%s603_s25 + $0x38] sm:$0xff] }
  0x19   : > { %v161_v32 = vld [vmem:[%s603_s25 + $0x70] sm:$0xff]  ;;  %v162_v36 = vld [vmem:[%s603_s25 + $0x78] sm:$0xff] }
  0x1d   : > { %509 = vmatmul.msk.f32.gmra.mxu2 %vm184_vm0, %v164_v9  ;;  %517 = vmatmul.msk.f32.gmra.mxu3 %vm184_vm0, %v172_v10 }
  0x1f   : > { %493 = vmatmul.msk.f32.gmra.mxu0 %vm184_vm0, %v148_v11  ;;  %501 = vmatmul.msk.f32.gmra.mxu1 %vm184_vm0, %v156_v12 }
  0x25   : > { %510 = vmatmul.msk.f32.gmra.mxu2 %vm184_vm0, %v165_v13  ;;  %518 = vmatmul.msk.f32.gmra.mxu3 %vm184_vm0, %v173_v14 }
  0x27   : > { %494 = vmatmul.msk.f32.gmra.mxu0 %vm184_vm0, %v149_v15  ;;  %502 = vmatmul.msk.f32.gmra.mxu1 %vm184_vm0, %v157_v16 }
  0x2d   : > { %511 = vmatmul.msk.f32.gmra.mxu2 %vm184_vm0, %v166_v17  ;;  %519 = vmatmul.msk.f32.gmra.mxu3 %vm184_vm0, %v174_v18 }
  0x2f   : > { %495 = vmatmul.msk.f32.gmra.mxu0 %vm184_vm0, %v150_v19  ;;  %503 = vmatmul.msk.f32.gmra.mxu1 %vm184_vm0, %v158_v20 }
  0x35   : > { %512 = vmatmul.msk.f32.gmra.mxu2 %vm184_vm0, %v167_v21  ;;  %520 = vmatmul.msk.f32.gmra.mxu3 %vm184_vm0, %v175_v22 }
  0x37   : > { %496 = vmatmul.msk.f32.gmra.mxu0 %vm184_vm0, %v151_v23  ;;  %504 = vmatmul.msk.f32.gmra.mxu1 %vm184_vm0, %v159_v24 }
  0x3d   : > { %513 = vmatmul.msk.f32.gmra.mxu2 %vm184_vm0, %v168_v25  ;;  %521 = vmatmul.msk.f32.gmra.mxu3 %vm184_vm0, %v176_v26 }
  0x3f   : > { %497 = vmatmul.msk.f32.gmra.mxu0 %vm184_vm0, %v152_v27  ;;  %505 = vmatmul.msk.f32.gmra.mxu1 %vm184_vm0, %v160_v28 }
  0x45   : > { %514 = vmatmul.msk.f32.gmra.mxu2 %vm184_vm0, %v169_v29  ;;  %522 = vmatmul.msk.f32.gmra.mxu3 %vm184_vm0, %v177_v30 }
  0x47   : > { %498 = vmatmul.msk.f32.gmra.mxu0 %vm184_vm0, %v153_v31  ;;  %506 = vmatmul.msk.f32.gmra.mxu1 %vm184_vm0, %v161_v32 }
  0x4d   : > { %515 = vmatmul.msk.f32.gmra.mxu2 %vm184_vm0, %v170_v33  ;;  %523 = vmatmul.msk.f32.gmra.mxu3 %vm184_vm0, %v178_v34 }
  0x4f   : > { %499 = vmatmul.msk.f32.gmra.mxu0 %vm184_vm0, %v154_v35  ;;  %507 = vmatmul.msk.f32.gmra.mxu1 %vm184_vm0, %v162_v36 }
  0x94   : > { %v298_v37 = vpop.f32.mrf.mxu0  ;;  %v322_v38 = vpop.f32.mrf.mxu1 }
  0x95   : > { %395 = vst.msk [vmem:[%s674_s28] sm:$0xff] %vm394_vm1, %v298_v37 }
  0x96   : > { %403 = vst.msk [vmem:[%s674_s28 + $0x40] sm:$0xff] %vm394_vm1, %v322_v38 }
  0x98   : > { %v346_v39 = vpop.f32.mrf.mxu2  ;;  %v370_v40 = vpop.f32.mrf.mxu3 }
  0x99   : > { %411 = vst.msk [vmem:[%s674_s28 + $0x80] sm:$0xff] %vm394_vm1, %v346_v39 }
  0x9a   : > { %419 = vst.msk [vmem:[%s674_s28 + $0xc0] sm:$0xff] %vm394_vm1, %v370_v40 }
  0x9c   : > { %v301_v41 = vpop.f32.mrf.mxu0  ;;  %v325_v42 = vpop.f32.mrf.mxu1 }
  0x9d   : > { %396 = vst.msk [vmem:[%s674_s28 + $0x8] sm:$0xff] %vm394_vm1, %v301_v41 }
  0x9e   : > { %404 = vst.msk [vmem:[%s674_s28 + $0x48] sm:$0xff] %vm394_vm1, %v325_v42 }
  0xa0   : > { %v349_v43 = vpop.f32.mrf.mxu2  ;;  %v373_v44 = vpop.f32.mrf.mxu3 }
  0xa1   : > { %412 = vst.msk [vmem:[%s674_s28 + $0x88] sm:$0xff] %vm394_vm1, %v349_v43 }
  0xa2   : > { %420 = vst.msk [vmem:[%s674_s28 + $0xc8] sm:$0xff] %vm394_vm1, %v373_v44 }
  0xa4   : > { %v304_v45 = vpop.f32.mrf.mxu0  ;;  %v328_v46 = vpop.f32.mrf.mxu1 }
  0xa5   : > { %397 = vst.msk [vmem:[%s674_s28 + $0x10] sm:$0xff] %vm394_vm1, %v304_v45 }
  0xa6   : > { %405 = vst.msk [vmem:[%s674_s28 + $0x50] sm:$0xff] %vm394_vm1, %v328_v46 }
  0xa8   : > { %v352_v47 = vpop.f32.mrf.mxu2  ;;  %v376_v48 = vpop.f32.mrf.mxu3 }
  0xa9   : > { %413 = vst.msk [vmem:[%s674_s28 + $0x90] sm:$0xff] %vm394_vm1, %v352_v47 }
  0xaa   : > { %421 = vst.msk [vmem:[%s674_s28 + $0xd0] sm:$0xff] %vm394_vm1, %v376_v48 }
  0xac   : > { %v307_v49 = vpop.f32.mrf.mxu0  ;;  %v331_v50 = vpop.f32.mrf.mxu1 }
  0xad   : > { %398 = vst.msk [vmem:[%s674_s28 + $0x18] sm:$0xff] %vm394_vm1, %v307_v49 }
  0xae   : > { %406 = vst.msk [vmem:[%s674_s28 + $0x58] sm:$0xff] %vm394_vm1, %v331_v50 }
  0xb0   : > { %v355_v51 = vpop.f32.mrf.mxu2  ;;  %v379_v52 = vpop.f32.mrf.mxu3 }
  0xb1   : > { %414 = vst.msk [vmem:[%s674_s28 + $0x98] sm:$0xff] %vm394_vm1, %v355_v51 }
  0xb2   : > { %422 = vst.msk [vmem:[%s674_s28 + $0xd8] sm:$0xff] %vm394_vm1, %v379_v52 }
  0xb4   : > { %v310_v53 = vpop.f32.mrf.mxu0  ;;  %v334_v54 = vpop.f32.mrf.mxu1 }
  0xb5   : > { %399 = vst.msk [vmem:[%s674_s28 + $0x20] sm:$0xff] %vm394_vm1, %v310_v53 }
  0xb6   : > { %407 = vst.msk [vmem:[%s674_s28 + $0x60] sm:$0xff] %vm394_vm1, %v334_v54 }
  0xb8   : > { %v358_v55 = vpop.f32.mrf.mxu2  ;;  %v382_v56 = vpop.f32.mrf.mxu3 }
  0xb9   : > { %415 = vst.msk [vmem:[%s674_s28 + $0xa0] sm:$0xff] %vm394_vm1, %v358_v55 }
  0xba   : > { %423 = vst.msk [vmem:[%s674_s28 + $0xe0] sm:$0xff] %vm394_vm1, %v382_v56 }
  0xbc   : > { %v313_v57 = vpop.f32.mrf.mxu0  ;;  %v337_v58 = vpop.f32.mrf.mxu1 }
  0xbd   : > { %400 = vst.msk [vmem:[%s674_s28 + $0x28] sm:$0xff] %vm394_vm1, %v313_v57 }
  0xbe   : > { %408 = vst.msk [vmem:[%s674_s28 + $0x68] sm:$0xff] %vm394_vm1, %v337_v58 }
  0xc0   : > { %v361_v59 = vpop.f32.mrf.mxu2  ;;  %v385_v60 = vpop.f32.mrf.mxu3 }
  0xc1   : > { %416 = vst.msk [vmem:[%s674_s28 + $0xa8] sm:$0xff] %vm394_vm1, %v361_v59 }
  0xc2   : > { %424 = vst.msk [vmem:[%s674_s28 + $0xe8] sm:$0xff] %vm394_vm1, %v385_v60 }
  0xc4   : > { %v316_v61 = vpop.f32.mrf.mxu0  ;;  %v340_v62 = vpop.f32.mrf.mxu1 }
  0xc5   : > { %401 = vst.msk [vmem:[%s674_s28 + $0x30] sm:$0xff] %vm394_vm1, %v316_v61 }
  0xc6   : > { %409 = vst.msk [vmem:[%s674_s28 + $0x70] sm:$0xff] %vm394_vm1, %v340_v62 }
  0xc8   : > { %v364_v63 = vpop.f32.mrf.mxu2  ;;  %v388_v0 = vpop.f32.mrf.mxu3 }
  0xc9   : > { %417 = vst.msk [vmem:[%s674_s28 + $0xb0] sm:$0xff] %vm394_vm1, %v364_v63 }
  0xca   : > { %425 = vst.msk [vmem:[%s674_s28 + $0xf0] sm:$0xff] %vm394_vm1, %v388_v0 }
  0xcc   : > { %v319_v1 = vpop.f32.mrf.mxu0  ;;  %v343_v2 = vpop.f32.mrf.mxu1 }
  0xcd   : > { %402 = vst.msk [vmem:[%s674_s28 + $0x38] sm:$0xff] %vm394_vm1, %v319_v1 }
  0xce   : > { %410 = vst.msk [vmem:[%s674_s28 + $0x78] sm:$0xff] %vm394_vm1, %v343_v2 }
  0xd0   : > { %v367_v3 = vpop.f32.mrf.mxu2  ;;  %v391_v4 = vpop.f32.mrf.mxu3 }
  0xd1   : > { %418 = vst.msk [vmem:[%s674_s28 + $0xb8] sm:$0xff] %vm394_vm1, %v367_v3 }
  0xd2   : > { %426 = vst.msk [vmem:[%s674_s28 + $0xf8] sm:$0xff] %vm394_vm1, %v391_v4 }
  0xd3 PF: > { %s12_s9 = sadd.s32 1, %s555_s9  }
  0xd4   : > { %p9_p4 = scmp.ge.s32.totalorder %s12_s9, 4  }
  0xd6   :  { %11 = sbr.rel (!%p9_p4) target bundleno = 1 (0x1), region = 58 }

</bundles_post_ra>
